<compile_context>
chip_gen: v5e
topology: v5e:2x2
jax: 0.10.0
libtpu: 0.0.40
codegen_flags: <defaults>
</compile_context>

<pallas_src>
import functools

import jax
import jax.numpy as jnp
from jax import lax
from jax.experimental import pallas as pl
from jax.experimental.pallas import tpu as pltpu


def _vmem_limit_bytes():
    # v5e/v6e: 128 MiB physical VMEM, v7x: 64 MiB.  Use ~3/4 of it, capped at 96 MiB.
    try:
        cap = int(pltpu.get_tpu_info().vmem_capacity_bytes)
        return min((cap * 3) // 4, 96 * 1024 * 1024)
    except Exception:
        return 48 * 1024 * 1024          # safe on every generation


_VMEM_LIMIT = _vmem_limit_bytes()


def _cparams(dims):
    return pltpu.CompilerParams(dimension_semantics=dims,
                                vmem_limit_bytes=_VMEM_LIMIT)


def _tile(dim, target, min_tile):
    """Largest power-of-two tile <= target that divides dim, else the full dim."""
    # TODO(synk): pad T to a multiple of the row tile instead of falling back to one
    #             full-size block for awkward prefill lengths.
    if dim <= target:
        return dim
    t = target
    while t > min_tile and dim % t != 0:
        t //= 2
    return t if dim % t == 0 else dim


# ----------------------------------------------------------------------------
# RMSNorm (FastRMSNorm semantics: fused residual add, returns (normed, new_res))
# ----------------------------------------------------------------------------
def _rmsnorm_res_kernel(x_ref, res_ref, w_ref, normed_ref, newres_ref, *, eps):
    h = x_ref[...].astype(jnp.float32) + res_ref[...].astype(jnp.float32)
    newres_ref[...] = h.astype(newres_ref.dtype)
    var = jnp.mean(h * h, axis=-1, keepdims=True)
    normed = h * lax.rsqrt(var + eps)
    normed_ref[...] = (normed * w_ref[...].astype(jnp.float32)).astype(normed_ref.dtype)


def _rmsnorm_kernel(x_ref, w_ref, normed_ref, *, eps):
    h = x_ref[...].astype(jnp.float32)
    var = jnp.mean(h * h, axis=-1, keepdims=True)
    normed = h * lax.rsqrt(var + eps)
    normed_ref[...] = (normed * w_ref[...].astype(jnp.float32)).astype(normed_ref.dtype)


def rmsnorm_residual(x, residual, weight, eps, *, tm=512):
    T, H = x.shape
    tm = _tile(T, tm, 8)
    w2d = weight.reshape(1, H)
    row = pl.BlockSpec((tm, H), lambda i: (i, 0))
    wspec = pl.BlockSpec((1, H), lambda i: (0, 0))
    if residual is None:
        normed = pl.pallas_call(
            functools.partial(_rmsnorm_kernel, eps=eps),
            grid=(T // tm,),
            in_specs=[row, wspec],
            out_specs=row,
            out_shape=jax.ShapeDtypeStruct((T, H), x.dtype),
            compiler_params=_cparams(("parallel",)),
        )(x, w2d)
        return normed, x
    normed, newres = pl.pallas_call(
        functools.partial(_rmsnorm_res_kernel, eps=eps),
        grid=(T // tm,),
        in_specs=[row, row, wspec],
        out_specs=[row, row],
        out_shape=[jax.ShapeDtypeStruct((T, H), x.dtype),
                   jax.ShapeDtypeStruct((T, H), x.dtype)],
        compiler_params=_cparams(("parallel",)),
    )(x, residual, w2d)
    return normed, newres


# ----------------------------------------------------------------------------
# Tiled / pipelined dense projection: y = x @ w_t  (w_t pre-transposed [in, out])
# ----------------------------------------------------------------------------
def _matmul_kernel(x_ref, w_ref, o_ref, acc_ref):
    @pl.when(pl.program_id(2) == 0)
    def _():
        acc_ref[...] = jnp.zeros_like(acc_ref)

    acc_ref[...] += jnp.dot(x_ref[...], w_ref[...],
                            preferred_element_type=jnp.float32)

    @pl.when(pl.program_id(2) == pl.num_programs(2) - 1)
    def _():
        o_ref[...] = acc_ref[...].astype(o_ref.dtype)


def linear(x, w_t, *, tm=512, tn=512, tk=4096):
    T, K = x.shape
    K2, N = w_t.shape
    assert K == K2
    tm = _tile(T, tm, 8)
    tn = _tile(N, tn, 128)
    tk = _tile(K, tk, 128)
    return pl.pallas_call(
        _matmul_kernel,
        grid=(T // tm, N // tn, K // tk),
        in_specs=[pl.BlockSpec((tm, tk), lambda i, j, k: (i, k)),
                  pl.BlockSpec((tk, tn), lambda i, j, k: (k, j))],
        out_specs=pl.BlockSpec((tm, tn), lambda i, j, k: (i, j)),
        out_shape=jax.ShapeDtypeStruct((T, N), x.dtype),
        scratch_shapes=[pltpu.VMEM((tm, tn), jnp.float32)],
        compiler_params=_cparams(("parallel", "parallel", "arbitrary")),
    )(x, w_t)


# ----------------------------------------------------------------------------
# Fused QKV projection + neox rotary epilogue (q/k/v as three separate outputs)
# ----------------------------------------------------------------------------
def _qkv_rope_kernel(x_ref, wq_ref, wk_ref, wv_ref,
                     cq_ref, sq_ref, ck_ref, sk_ref,
                     q_ref, k_ref, v_ref,
                     accq_ref, acck_ref, accv_ref, *, n_heads, n_kv, head_dim):
    kstep = pl.program_id(1)

    @pl.when(kstep == 0)
    def _():
        accq_ref[...] = jnp.zeros_like(accq_ref)
        acck_ref[...] = jnp.zeros_like(acck_ref)
        accv_ref[...] = jnp.zeros_like(accv_ref)

    x = x_ref[...]
    accq_ref[...] += jnp.dot(x, wq_ref[...], preferred_element_type=jnp.float32)
    acck_ref[...] += jnp.dot(x, wk_ref[...], preferred_element_type=jnp.float32)
    accv_ref[...] += jnp.dot(x, wv_ref[...], preferred_element_type=jnp.float32)

    @pl.when(kstep == pl.num_programs(1) - 1)
    def _():
        d = head_dim
        half = d // 2
        cq, sq = cq_ref[...], sq_ref[...]
        ck, sk = ck_ref[...], sk_ref[...]

        def rope(xh, c, s):
            rot = jnp.concatenate([xh[:, half:], xh[:, :half]], axis=1)
            return xh * c + rot * s

        for h in range(n_heads):
            xh = accq_ref[:, h * d:(h + 1) * d]
            q_ref[:, h * d:(h + 1) * d] = rope(xh, cq, sq).astype(q_ref.dtype)
        for h in range(n_kv):
            xh = acck_ref[:, h * d:(h + 1) * d]
            k_ref[:, h * d:(h + 1) * d] = rope(xh, ck, sk).astype(k_ref.dtype)
        v_ref[...] = accv_ref[...].astype(v_ref.dtype)


def qkv_rope(x, wq_t, wk_t, wv_t, cos, sin, scale, n_heads, n_kv, head_dim,
             *, tm=256, tk=512):
    T, H = x.shape
    d = head_dim
    nq, nk = n_heads * d, n_kv * d
    tm = _tile(T, tm, 8)
    tk = _tile(H, tk, 128)
    # neox rotate-half tables [T, head_dim]; softmax scale folded into the q tables
    cos_full = jnp.concatenate([cos, cos], axis=-1).astype(jnp.float32)
    sin_full = jnp.concatenate([-sin, sin], axis=-1).astype(jnp.float32)
    cq, sq = cos_full * scale, sin_full * scale
    row_d = pl.BlockSpec((tm, d), lambda i, k: (i, 0))
    q, kk, v = pl.pallas_call(
        functools.partial(_qkv_rope_kernel, n_heads=n_heads, n_kv=n_kv,
                          head_dim=d),
        grid=(T // tm, H // tk),
        in_specs=[pl.BlockSpec((tm, tk), lambda i, k: (i, k)),
                  pl.BlockSpec((tk, nq), lambda i, k: (k, 0)),
                  pl.BlockSpec((tk, nk), lambda i, k: (k, 0)),
                  pl.BlockSpec((tk, nk), lambda i, k: (k, 0)),
                  row_d, row_d, row_d, row_d],
        out_specs=[pl.BlockSpec((tm, nq), lambda i, k: (i, 0)),
                   pl.BlockSpec((tm, nk), lambda i, k: (i, 0)),
                   pl.BlockSpec((tm, nk), lambda i, k: (i, 0))],
        out_shape=[jax.ShapeDtypeStruct((T, nq), x.dtype),
                   jax.ShapeDtypeStruct((T, nk), x.dtype),
                   jax.ShapeDtypeStruct((T, nk), x.dtype)],
        scratch_shapes=[pltpu.VMEM((tm, nq), jnp.float32),
                        pltpu.VMEM((tm, nk), jnp.float32),
                        pltpu.VMEM((tm, nk), jnp.float32)],
        compiler_params=_cparams(("parallel", "arbitrary")),
    )(x, wq_t, wk_t, wv_t, cq, sq, cos_full, sin_full)
    return q, kk, v


# ----------------------------------------------------------------------------
# Blocked causal flash attention (prefill), GQA group batched, varlen segments
# ----------------------------------------------------------------------------
def _flash_attn_kernel(qseg_ref, kseg_ref, q_ref, k_ref, v_ref, o_ref,
                       m_ref, l_ref, acc_ref, *, tq, tkb, groups, head_dim):
    qi = pl.program_id(1)
    ki = pl.program_id(2)
    d = head_dim

    @pl.when(ki == 0)
    def _():
        m_ref[...] = jnp.full_like(m_ref, -1e30)
        l_ref[...] = jnp.zeros_like(l_ref)
        acc_ref[...] = jnp.zeros_like(acc_ref)

    def process(mask):
        k = k_ref[...]                               # (tkb, d), shared by the group
        v = v_ref[...]
        for gi in range(groups):
            q_h = q_ref[:, gi * d:(gi + 1) * d]      # (tq, d), scale pre-folded
            s = lax.dot_general(q_h, k, (((1,), (1,)), ((), ())),
                                preferred_element_type=jnp.float32)   # (tq, tkb)
            s = jnp.where(mask, s, -1e30)
            m_prev = m_ref[gi]
            m_new = jnp.maximum(m_prev, jnp.max(s, axis=-1, keepdims=True))
            alpha = jnp.exp(m_prev - m_new)
            # masked entries: exp(-1e30 - m_new) underflows to 0 once any real key
            # has been seen; fully-masked rows are rescaled away by a later alpha=0.
            p = jnp.exp(s - m_new)
            l_ref[gi] = alpha * l_ref[gi] + jnp.sum(p, axis=-1, keepdims=True)
            acc_ref[gi] = alpha * acc_ref[gi] + jnp.dot(
                p.astype(v.dtype), v, preferred_element_type=jnp.float32)
            m_ref[gi] = m_new

    in_range = ki * tkb <= qi * tq + (tq - 1)        # not entirely above the diagonal
    interior = qi * tq >= ki * tkb + (tkb - 1)       # entirely below the diagonal

    @pl.when(jnp.logical_and(in_range, interior))
    def _():
        process(qseg_ref[...] == kseg_ref[...])      # segment mask only

    @pl.when(jnp.logical_and(in_range, jnp.logical_not(interior)))
    def _():
        q_pos = qi * tq + lax.broadcasted_iota(jnp.int32, (tq, tkb), 0)
        k_pos = ki * tkb + lax.broadcasted_iota(jnp.int32, (tq, tkb), 1)
        process((qseg_ref[...] == kseg_ref[...]) & (q_pos >= k_pos))

    @pl.when(ki == pl.num_programs(2) - 1)
    def _():
        for gi in range(groups):
            inv = 1.0 / jnp.maximum(l_ref[gi], 1e-30)
            o_ref[:, gi * d:(gi + 1) * d] = (acc_ref[gi] * inv).astype(o_ref.dtype)


def flash_causal_attention(q, k, v, seg_ids, num_heads, num_kv_heads, head_dim,
                           *, tq=512, tkb=512):
    """q: [T, nH*d] (softmax scale pre-folded), k/v: [T, nKV*d].

    The grid iterates kv heads so each K/V tile is fetched once per GQA group, and
    the causal clamp in the K/V index_map prevents DMA of fully-masked KV blocks."""
    T = q.shape[0]
    d = head_dim
    tq = _tile(T, tq, 8)
    tkb = _tile(T, tkb, 128)
    groups = num_heads // num_kv_heads
    gd = groups * d
    seg_col = seg_ids.reshape(T, 1)
    seg_row = seg_ids.reshape(1, T)

    def kv_block(qi, ki):
        # clamp to the last block that can contain causal keys for this q tile
        return jnp.minimum(ki, (qi * tq + (tq - 1)) // tkb)

    kernel = functools.partial(_flash_attn_kernel, tq=tq, tkb=tkb,
                               groups=groups, head_dim=d)
    return pl.pallas_call(
        kernel,
        grid=(num_kv_heads, T // tq, T // tkb),
        in_specs=[
            pl.BlockSpec((tq, 1), lambda g, qi, ki: (qi, 0)),
            pl.BlockSpec((1, tkb), lambda g, qi, ki: (0, kv_block(qi, ki))),
            pl.BlockSpec((tq, gd), lambda g, qi, ki: (qi, g)),
            pl.BlockSpec((tkb, d), lambda g, qi, ki: (kv_block(qi, ki), g)),
            pl.BlockSpec((tkb, d), lambda g, qi, ki: (kv_block(qi, ki), g)),
        ],
        out_specs=pl.BlockSpec((tq, gd), lambda g, qi, ki: (qi, g)),
        out_shape=jax.ShapeDtypeStruct((T, num_heads * d), q.dtype),
        scratch_shapes=[
            pltpu.VMEM((groups, tq, 1), jnp.float32),
            pltpu.VMEM((groups, tq, 1), jnp.float32),
            pltpu.VMEM((groups, tq, d), jnp.float32),
        ],
        compiler_params=_cparams(("parallel", "parallel", "arbitrary")),
    )(seg_col, seg_row, q, k, v)


# ----------------------------------------------------------------------------
# SwiGLU MLP: intermediate dim tiled as a grid reduction (weights streamed)
# ----------------------------------------------------------------------------
def _mlp_kernel(x_ref, wg_ref, wu_ref, wd_ref, o_ref, acc_ref):
    ki = pl.program_id(1)

    @pl.when(ki == 0)
    def _():
        acc_ref[...] = jnp.zeros_like(acc_ref)

    x = x_ref[...]
    gate = jnp.dot(x, wg_ref[...], preferred_element_type=jnp.float32)
    up = jnp.dot(x, wu_ref[...], preferred_element_type=jnp.float32)
    h = (gate * jax.nn.sigmoid(gate)) * up               # SiLU(gate) * up, f32 VPU
    acc_ref[...] += jnp.dot(h.astype(x.dtype), wd_ref[...],
                            preferred_element_type=jnp.float32)

    @pl.when(ki == pl.num_programs(1) - 1)
    def _():
        o_ref[...] = acc_ref[...].astype(o_ref.dtype)


def llama_mlp(x, wg_t, wu_t, wd_t, *, tm=256, tki=512):
    # TODO(synk): only hidden_act='silu' is implemented; for very large H on v7x the
    #             (tm, H) accumulator should additionally be tiled along H.
    T, H = x.shape
    I = wg_t.shape[1]
    tm = _tile(T, tm, 8)
    tki = _tile(I, tki, 128)
    return pl.pallas_call(
        _mlp_kernel,
        grid=(T // tm, I // tki),
        in_specs=[pl.BlockSpec((tm, H), lambda i, k: (i, 0)),
                  pl.BlockSpec((H, tki), lambda i, k: (0, k)),
                  pl.BlockSpec((H, tki), lambda i, k: (0, k)),
                  pl.BlockSpec((tki, H), lambda i, k: (k, 0))],
        out_specs=pl.BlockSpec((tm, H), lambda i, k: (i, 0)),
        out_shape=jax.ShapeDtypeStruct((T, H), x.dtype),
        scratch_shapes=[pltpu.VMEM((tm, H), jnp.float32)],
        compiler_params=_cparams(("parallel", "arbitrary")),
    )(x, wg_t, wu_t, wd_t)


# ----------------------------------------------------------------------------
# reshape_and_cache: in-place slot scatter via a data-dependent out index_map
# ----------------------------------------------------------------------------
def _kv_cache_kernel(slots_ref, knew_ref, vnew_ref, kc_in_ref, vc_in_ref,
                     kc_ref, vc_ref):
    del slots_ref, kc_in_ref, vc_in_ref      # aliasing preserves untouched slots
    kc_ref[...] = knew_ref[...]
    vc_ref[...] = vnew_ref[...]


def kv_cache_update(key_cache, value_cache, k_new, v_new, slots):
    """Scatter rotated K / raw V rows into the slot-addressed caches in place.
    The slot table is scalar-prefetched and drives the output index_map, so the
    per-token writeback DMAs are issued and overlapped by the Pallas pipeline."""
    T, n_kv, d = k_new.shape
    grid_spec = pltpu.PrefetchScalarGridSpec(
        num_scalar_prefetch=1,
        grid=(T,),
        in_specs=[
            pl.BlockSpec((1, n_kv, d), lambda i, slots: (i, 0, 0)),
            pl.BlockSpec((1, n_kv, d), lambda i, slots: (i, 0, 0)),
            pl.BlockSpec(memory_space=pl.ANY),      # key cache   (aliased, unused)
            pl.BlockSpec(memory_space=pl.ANY),      # value cache (aliased, unused)
        ],
        out_specs=[
            pl.BlockSpec((1, n_kv, d), lambda i, slots: (slots[i], 0, 0)),
            pl.BlockSpec((1, n_kv, d), lambda i, slots: (slots[i], 0, 0)),
        ],
    )
    return pl.pallas_call(
        _kv_cache_kernel,
        grid_spec=grid_spec,
        out_shape=[jax.ShapeDtypeStruct(key_cache.shape, key_cache.dtype),
                   jax.ShapeDtypeStruct(value_cache.shape, value_cache.dtype)],
        input_output_aliases={3: 0, 4: 1},
        compiler_params=_cparams(("arbitrary",)),
    )(slots, k_new, v_new, key_cache, value_cache)


# ----------------------------------------------------------------------------
# FlashLlamaLayer forward (prefill path)
# ----------------------------------------------------------------------------
def flash_llama_layer_forward(
    params,
    hidden_states,        # [T, H]
    residual,             # [T, H] or None
    cos, sin,             # [T, head_dim//2]
    cu_seqlen_prefill,    # [num_seqs + 1]
    kv_cache,             # (key_cache, value_cache): [num_slots, n_kv, d]
    block_tables,         # unused (decode path only)
    slots,                # [T] int32
    input_lengths,        # unused (decode path only)
    max_s,                # unused here
):
    cfg = params["config"]
    n_heads = cfg["num_heads"]
    n_kv = cfg["num_kv_heads"]
    d = cfg["head_size"]
    eps = cfg["rms_norm_eps"]
    scale = d ** (-0.5)
    T = hidden_states.shape[0]

    # --- input_layernorm (residual fused) -----------------------------------
    normed, res = rmsnorm_residual(hidden_states, residual,
                                   params["input_layernorm"], eps)

    # --- qkv projection + fused rotary (scale folded into q) ----------------
    q, k, v = qkv_rope(normed, params["w_q_t"], params["w_k_t"], params["w_v_t"],
                       cos, sin, scale, n_heads, n_kv, d)

    # --- reshape_and_cache: in-place slot scatter into the paged KV cache ----
    key_cache, value_cache = kv_cache
    key_cache, value_cache = kv_cache_update(
        key_cache, value_cache,
        k.reshape(T, n_kv, d), v.reshape(T, n_kv, d), slots)

    # --- prefill flash attention (causal + same-sequence mask, GQA batched) --
    positions = jnp.arange(T, dtype=cu_seqlen_prefill.dtype)
    seg_ids = (jnp.searchsorted(cu_seqlen_prefill, positions, side="right") - 1
               ).astype(jnp.int32)
    attn = flash_causal_attention(q, k, v, seg_ids, n_heads, n_kv, d)

    attn_output = linear(attn, params["w_o_t"])           # [T, H]

    # --- post attention layernorm (residual fused) + SwiGLU MLP --------------
    normed2, attn_res = rmsnorm_residual(attn_output, res,
                                         params["post_attention_layernorm"], eps)
    mlp_output = llama_mlp(normed2, params["w_gate_t"], params["w_up_t"],
                           params["w_down_t"])

    return mlp_output, attn_res, (key_cache, value_cache)


# ----------------------------------------------------------------------------
# Deterministic parameters / inputs + pure-JAX reference + smoke test
# ----------------------------------------------------------------------------
def make_params(key, H, n_heads, n_kv, d, I, dtype=jnp.bfloat16):
    ks = jax.random.split(key, 9)

    def init_t(k, out_f, in_f):
        w = jax.random.normal(k, (out_f, in_f), jnp.float32) / jnp.sqrt(in_f)
        return w.T.astype(dtype)                  # pre-transpose once: [in, out]

    return {
        "config": {"num_heads": n_heads, "num_kv_heads": n_kv,
                   "head_size": d, "rms_norm_eps": 1e-5},
        "input_layernorm": (
            1.0 + 0.01 * jax.random.normal(ks[0], (H,), jnp.float32)).astype(dtype),
        "post_attention_layernorm": (
            1.0 + 0.01 * jax.random.normal(ks[1], (H,), jnp.float32)).astype(dtype),
        "w_q_t": init_t(ks[2], n_heads * d, H),
        "w_k_t": init_t(ks[3], n_kv * d, H),
        "w_v_t": init_t(ks[4], n_kv * d, H),
        "w_o_t": init_t(ks[5], H, n_heads * d),
        "w_gate_t": init_t(ks[6], I, H),
        "w_up_t": init_t(ks[7], I, H),
        "w_down_t": init_t(ks[8], H, I),
    }


def reference_forward(params, hidden, residual, cos, sin, cu, n_heads, n_kv, d, eps):
    f32 = jnp.float32
    scale = d ** (-0.5)
    T = hidden.shape[0]
    groups = n_heads // n_kv

    def rms(h, w):
        var = jnp.mean(h * h, axis=-1, keepdims=True)
        return h * lax.rsqrt(var + eps) * w.astype(f32)

    h = hidden.astype(f32) + residual.astype(f32)
    res = h
    normed = rms(h, params["input_layernorm"])

    q = normed @ params["w_q_t"].astype(f32)
    k = normed @ params["w_k_t"].astype(f32)
    v = normed @ params["w_v_t"].astype(f32)

    cos_full = jnp.concatenate([cos, cos], -1)
    sin_full = jnp.concatenate([-sin, sin], -1)

    def rope(x, n):
        x = x.reshape(T, n, d)
        rot = jnp.concatenate([x[..., d // 2:], x[..., :d // 2]], -1)
        return x * cos_full[:, None, :] + rot * sin_full[:, None, :]

    qh = rope(q, n_heads)
    kh = rope(k, n_kv)
    vh = v.reshape(T, n_kv, d)

    kh_g = jnp.repeat(kh, groups, axis=1)
    vh_g = jnp.repeat(vh, groups, axis=1)

    positions = jnp.arange(T)
    seg = jnp.searchsorted(cu, positions.astype(cu.dtype), side="right") - 1
    mask = (positions[:, None] >= positions[None, :]) & (seg[:, None] == seg[None, :])

    s = jnp.einsum("qhd,khd->hqk", qh, kh_g) * scale
    s = jnp.where(mask[None], s, -1e30)
    p = jax.nn.softmax(s, axis=-1)
    o = jnp.einsum("hqk,khd->qhd", p, vh_g).reshape(T, n_heads * d)

    attn_out = o @ params["w_o_t"].astype(f32)
    h2 = attn_out + res
    normed2 = rms(h2, params["post_attention_layernorm"])
    g = normed2 @ params["w_gate_t"].astype(f32)
    u = normed2 @ params["w_up_t"].astype(f32)
    mlp = (g * jax.nn.sigmoid(g) * u) @ params["w_down_t"].astype(f32)
    return mlp, h2, kh.reshape(T, n_kv * d), v


if __name__ == "__main__":
    # Small config consistent with the module (head_dim=128 as in Llama).
    T = 16                 # total flattened tokens (two prefill sequences)
    n_heads, n_kv, d = 4, 2, 128
    H = n_heads * d        # hidden_size = 512
    I = 1024               # intermediate_size
    num_slots = 32
    rope_theta = 10000.0
    dtype = jnp.bfloat16

    key = jax.random.PRNGKey(0)
    k_par, k_h, k_r = jax.random.split(key, 3)
    params = make_params(k_par, H, n_heads, n_kv, d, I, dtype)

    hidden_states = jax.random.normal(k_h, (T, H), jnp.float32).astype(dtype)
    residual = jax.random.normal(k_r, (T, H), jnp.float32).astype(dtype)

    # rotary tables: [T, d//2], neox convention
    pos = jnp.arange(T, dtype=jnp.float32)[:, None]
    inv_freq = 1.0 / (rope_theta ** (jnp.arange(0, d, 2, dtype=jnp.float32) / d))
    freqs = pos * inv_freq[None, :]
    cos = jnp.cos(freqs)
    sin = jnp.sin(freqs)

    kv_cache = (jnp.zeros((num_slots, n_kv, d), dtype),
                jnp.zeros((num_slots, n_kv, d), dtype))
    slots = jnp.arange(T, dtype=jnp.int32)
    cu_seqlen_prefill = jnp.array([0, 10, T], dtype=jnp.int32)   # two sequences
    block_tables = jnp.zeros((2, 4), dtype=jnp.int32)
    input_lengths = jnp.array([10, T - 10], dtype=jnp.int32)
    max_s = T

    mlp_out, attn_res, (key_cache, value_cache) = flash_llama_layer_forward(
        params, hidden_states, residual, cos, sin, cu_seqlen_prefill,
        kv_cache, block_tables, slots, input_lengths, max_s)
    jax.block_until_ready((mlp_out, attn_res, key_cache, value_cache))

    # pure-JAX f32 reference for validation
    ref_mlp, ref_res, ref_k, ref_v = reference_forward(
        params, hidden_states, residual, cos, sin, cu_seqlen_prefill,
        n_heads, n_kv, d, params["config"]["rms_norm_eps"])

    def rel_err(a, b):
        a = a.astype(jnp.float32).ravel()
        b = b.astype(jnp.float32).ravel()
        return float(jnp.linalg.norm(a - b) / (jnp.linalg.norm(b) + 1e-6))

    assert mlp_out.shape == (T, H) and attn_res.shape == (T, H)
    assert bool(jnp.all(jnp.isfinite(mlp_out.astype(jnp.float32))))
    assert bool(jnp.all(jnp.isfinite(attn_res.astype(jnp.float32))))
    assert rel_err(mlp_out, ref_mlp) < 0.1, rel_err(mlp_out, ref_mlp)
    assert rel_err(attn_res, ref_res) < 0.1, rel_err(attn_res, ref_res)
    assert rel_err(key_cache[:T].reshape(T, -1), ref_k) < 0.1
    assert rel_err(value_cache[:T].reshape(T, -1), ref_v) < 0.1
    # slots not written by the scatter must keep their previous (zero) contents
    assert bool(jnp.all(key_cache[T:].astype(jnp.float32) == 0.0))
    assert bool(jnp.all(value_cache[T:].astype(jnp.float32) == 0.0))
    print("KERNEL_OK")
</pallas_src>

<mosaic_0001>
module attributes {stable_mosaic.version = 11 : i64} {
  func.func @_rmsnorm_res_kernel(%arg0: i32, %arg1: memref<16x512xbf16, #tpu.memory_space<vmem>>, %arg2: memref<16x512xbf16, #tpu.memory_space<vmem>>, %arg3: memref<1x512xbf16, #tpu.memory_space<vmem>>, %arg4: memref<16x512xbf16, #tpu.memory_space<vmem>>, %arg5: memref<16x512xbf16, #tpu.memory_space<vmem>>) attributes {dimension_semantics = [#tpu.dimension_semantics<parallel>], iteration_bounds = array<i64: 1>, scalar_prefetch = 0 : i64, scratch_operands = 0 : i64, tpu.core_type = #tpu.core_type<tc>, window_params = [{transform_indices = @transform_0, window_bounds = array<i64: 16, 512>}, {transform_indices = @transform_1, window_bounds = array<i64: 16, 512>}, {pipeline_mode = #tpu.pipeline_mode<synchronous>, transform_indices = @transform_2, window_bounds = array<i64: 1, 512>}, {transform_indices = @transform_3, window_bounds = array<i64: 16, 512>}, {transform_indices = @transform_4, window_bounds = array<i64: 16, 512>}]} {
    %c0 = arith.constant 0 : index
    %c0_0 = arith.constant 0 : index
    %0 = vector.load %arg1[%c0, %c0_0] : memref<16x512xbf16, #tpu.memory_space<vmem>>, vector<16x512xbf16>
    %1 = arith.extf %0 : vector<16x512xbf16> to vector<16x512xf32>
    %c0_1 = arith.constant 0 : index
    %c0_2 = arith.constant 0 : index
    %2 = vector.load %arg2[%c0_1, %c0_2] : memref<16x512xbf16, #tpu.memory_space<vmem>>, vector<16x512xbf16>
    %3 = arith.extf %2 : vector<16x512xbf16> to vector<16x512xf32>
    %4 = arith.addf %1, %3 : vector<16x512xf32>
    %5 = arith.truncf %4 : vector<16x512xf32> to vector<16x512xbf16>
    %c0_3 = arith.constant 0 : index
    %c0_4 = arith.constant 0 : index
    %6 = vector.load %arg5[%c0_3, %c0_4] : memref<16x512xbf16, #tpu.memory_space<vmem>>, vector<16x512xbf16>
    tpu.vector_store %arg5[%c0_3, %c0_4], %5 {strides = array<i32>} : memref<16x512xbf16, #tpu.memory_space<vmem>>, vector<16x512xbf16>,
    %7 = arith.mulf %4, %4 : vector<16x512xf32>
    %cst = arith.constant dense<0.000000e+00> : vector<16xf32>
    %8 = vector.multi_reduction <add>, %7, %cst [1] : vector<16x512xf32> to vector<16xf32>
    %9 = vector.shape_cast %8 : vector<16xf32> to vector<16x1xf32>
    %cst_5 = arith.constant 5.120000e+02 : f32
    %10 = vector.broadcast %cst_5 : f32 to vector<16x1xf32>
    %11 = arith.divf %9, %10 : vector<16x1xf32>
    %cst_6 = arith.constant 9.99999974E-6 : f32
    %12 = vector.broadcast %cst_6 : f32 to vector<16x1xf32>
    %13 = arith.addf %11, %12 : vector<16x1xf32>
    %14 = math.rsqrt %13 : vector<16x1xf32>
    %15 = vector.broadcast %14 : vector<16x1xf32> to vector<16x512xf32>
    %16 = arith.mulf %4, %15 : vector<16x512xf32>
    %c0_7 = arith.constant 0 : index
    %c0_8 = arith.constant 0 : index
    %17 = vector.load %arg3[%c0_7, %c0_8] : memref<1x512xbf16, #tpu.memory_space<vmem>>, vector<1x512xbf16>
    %18 = arith.extf %17 : vector<1x512xbf16> to vector<1x512xf32>
    %19 = vector.broadcast %18 : vector<1x512xf32> to vector<16x512xf32>
    %20 = arith.mulf %16, %19 : vector<16x512xf32>
    %21 = arith.truncf %20 : vector<16x512xf32> to vector<16x512xbf16>
    %c0_9 = arith.constant 0 : index
    %c0_10 = arith.constant 0 : index
    %22 = vector.load %arg4[%c0_9, %c0_10] : memref<16x512xbf16, #tpu.memory_space<vmem>>, vector<16x512xbf16>
    tpu.vector_store %arg4[%c0_9, %c0_10], %21 {strides = array<i32>} : memref<16x512xbf16, #tpu.memory_space<vmem>>, vector<16x512xbf16>,
    return
  }
  func.func @transform_0(%arg0: i32) -> (i32, i32) {
    %c0_i32 = arith.constant 0 : i32
    %c0_i32_0 = arith.constant 0 : i32
    return %arg0, %c0_i32 : i32, i32
  }
  func.func @transform_1(%arg0: i32) -> (i32, i32) {
    %c0_i32 = arith.constant 0 : i32
    %c0_i32_0 = arith.constant 0 : i32
    return %arg0, %c0_i32 : i32, i32
  }
  func.func @transform_2(%arg0: i32) -> (i32, i32) {
    %c0_i32 = arith.constant 0 : i32
    %c0_i32_0 = arith.constant 0 : i32
    %c0_i32_1 = arith.constant 0 : i32
    return %c0_i32, %c0_i32_0 : i32, i32
  }
  func.func @transform_3(%arg0: i32) -> (i32, i32) {
    %c0_i32 = arith.constant 0 : i32
    %c0_i32_0 = arith.constant 0 : i32
    return %arg0, %c0_i32 : i32, i32
  }
  func.func @transform_4(%arg0: i32) -> (i32, i32) {
    %c0_i32 = arith.constant 0 : i32
    %c0_i32_0 = arith.constant 0 : i32
    return %arg0, %c0_i32 : i32, i32
  }
}

</mosaic_0001>

<bundles_post_ra>
// kernel: tpu_custom_call.1
= control target key start
LH: loop header
LB: loop body
LE: loop exit
PB: predicated region body
PF: predicated region fallthrough
CT: control target
= control target key end

     0   :  { %10 = vsyncpa [#allocation3], 0  ;;  %s479_s0 = inlined_call_operand.hbm [shape: bf16[16,512], index: 0, kind: input, shape index: {}]   ;;  %s480_s1 = inlined_call_operand.hbm [shape: bf16[16,512], index: 1, kind: input, shape index: {}]   ;;  %s481_s2 = inlined_call_operand.hbm [shape: bf16[1,512], index: 2, kind: input, shape index: {}]   ;;  %s482_s3 = inlined_call_operand.hbm [shape: bf16[16,512], index: 3, kind: output, shape index: {0}]   ;;  %s483_s4 = inlined_call_operand.hbm [shape: bf16[16,512], index: 4, kind: output, shape index: {1}]  }
   0x1   :  { %11 = vsyncpa [#allocation6], 0 }
   0x2   :  { %12 = vsyncpa [#allocation4], 0 }
   0x3   :  { %13 = vsyncpa [#allocation10], 0  ;;  %s31_s17 = sshll.u32 %s480_s1, 4  ;;  %s371_s18 = smov [#allocation5]   ;;  %s32_s17 = int_to_ptr.hbm [resolvable:$true] %s31_s17 }
   0x4   :  { %s33_s19 = sshll.u32 %s371_s18, 4  ;;  %s18_s22 = sshll.u32 %s479_s0, 4  ;;  %s34_s19 = int_to_ptr.vmem [resolvable:$true] %s33_s19  ;;  %s19_s22 = int_to_ptr.hbm [resolvable:$true] %s18_s22 }
   0x5   :  { %s372_s23 = smov 256   ;;  %s373_s24 = smov 16  }
   0x6   :  { %39 = dma.hbm_to_vmem [thread:$0]  %s32_s17, 512, %s34_s19, [#allocation6], %s372_s23, %s372_s23, %s373_s24  }
   0x7   :  { %s374_s25 = smov [#allocation2]   ;;  %s45_s1 = sshll.u32 %s481_s2, 4  ;;  %s46_s1 = int_to_ptr.hbm [resolvable:$true] %s45_s1 }
   0x8   :  { %s20_s26 = sshll.u32 %s374_s25, 4  ;;  %s375_s0 = smov [#allocation7]   ;;  %s21_s26 = int_to_ptr.vmem [resolvable:$true] %s20_s26 }
   0x9   :  { %26 = dma.hbm_to_vmem [thread:$0]  %s19_s22, 512, %s21_s26, [#allocation3], %s372_s23, %s372_s23, %s373_s24  }
   0xa   :  { %s47_s29 = sshll.u32 %s375_s0, 4  ;;  %s48_s29 = int_to_ptr.vmem [resolvable:$true] %s47_s29 }
   0xb   :  { %50 = dma.hbm_to_vmem [thread:$0]  %s46_s1, 64, %s48_s29, [#allocation6]  }
   0xc   :  { %363 = dma.done.wait [#allocation3], 512  }
   0xd   :  { %364 = vsyncadd [#allocation3], 4294966784 }
   0xe   :  { %365 = dma.done.wait [#allocation6], 576  }
   0xf   :  { %366 = vsyncadd [#allocation6], 4294966720  ;;  %v63_v0 = vld [vmem:[#allocation2] sm:$0xff]  ;;  %v64_v1 = vld [vmem:[#allocation2 + $0x8] sm:$0xff]  ;;  %v376_v48 = vmov 512.0   ;;  %s377_s2 = smov [#allocation9]  }
  0x10   :  { %v75_v2 = vld [vmem:[#allocation5] sm:$0xff]  ;;  %v67_v3 = vunpack.c.l.bf16 %v63_v0  ;;  %v68_v4 = vunpack.c.h.bf16 %v63_v0  ;;  %v69_v5 = vunpack.c.l.bf16 %v64_v1  ;;  %v70_v6 = vunpack.c.h.bf16 %v64_v1  ;;  %v76_v7 = vld [vmem:[#allocation5 + $0x8] sm:$0xff]  ;;  %v65_v8 = vld [vmem:[#allocation2 + $0x10] sm:$0xff]  ;;  %s208_s30 = sshll.u32 %s377_s2, 4  ;;  %s210_s7 = sshll.u32 %s483_s4, 4  ;;  %s209_s30 = int_to_ptr.vmem [resolvable:$true] %s208_s30  ;;  %s211_s7 = int_to_ptr.hbm [resolvable:$true] %s210_s7 }
  0x11   :  { %v66_v9 = vld [vmem:[#allocation2 + $0x18] sm:$0xff]  ;;  %v79_v10 = vunpack.c.l.bf16 %v75_v2  ;;  %v80_v11 = vunpack.c.h.bf16 %v75_v2  ;;  %v81_v12 = vunpack.c.l.bf16 %v76_v7  ;;  %v82_v13 = vunpack.c.h.bf16 %v76_v7  ;;  %v77_v14 = vld [vmem:[#allocation5 + $0x10] sm:$0xff]  ;;  %v160_v62 = vld [vmem:[#allocation7] sm:$0xf]  ;;  %s378_s4 = smov [#allocation8]   ;;  %s197_s11 = sshll.u32 %s482_s3, 4  ;;  %s198_s11 = int_to_ptr.hbm [resolvable:$true] %s197_s11 }
  0x12   :  { %v78_v15 = vld [vmem:[#allocation5 + $0x18] sm:$0xff]  ;;  %v71_v16 = vunpack.c.l.bf16 %v65_v8  ;;  %v72_v17 = vunpack.c.h.bf16 %v65_v8  ;;  %v73_v18 = vunpack.c.l.bf16 %v66_v9  ;;  %v74_v19 = vunpack.c.h.bf16 %v66_v9  ;;  %s195_s8 = sshll.u32 %s378_s4, 4  ;;  %s196_s8 = int_to_ptr.vmem [resolvable:$true] %s195_s8 }
  0x13   :  { %v419_v20 = vadd.f32 %v79_v10, %v67_v3  ;;  %v421_v21 = vadd.f32 %v80_v11, %v68_v4  ;;  %v423_v22 = vadd.f32 %v81_v12, %v69_v5  ;;  %v425_v23 = vadd.f32 %v82_v13, %v70_v6 }
  0x14   :  { %v83_v24 = vunpack.c.l.bf16 %v77_v14  ;;  %v84_v25 = vunpack.c.h.bf16 %v77_v14  ;;  %v85_v26 = vunpack.c.l.bf16 %v78_v15  ;;  %v86_v27 = vunpack.c.h.bf16 %v78_v15 }
  0x15   :  { %v96_v28 = vpack.c.bf16 %v425_v23, %v423_v22  ;;  %v103_v29 = vmul.f32 %v419_v20, %v419_v20  ;;  %v104_v30 = vmul.f32 %v421_v21, %v421_v21  ;;  %v105_v31 = vmul.f32 %v423_v22, %v423_v22 }
  0x16   :  { %v435_v32 = vadd.f32 %v83_v24, %v71_v16  ;;  %v437_v33 = vadd.f32 %v84_v25, %v72_v17  ;;  %v439_v34 = vadd.f32 %v85_v26, %v73_v18  ;;  %v106_v35 = vmul.f32 %v425_v23, %v425_v23 }
  0x17   :  { %v111_v36 = vadd.f32 %v104_v30, %v103_v29  ;;  %100 = vst [vmem:[#allocation9 + $0x8] sm:$0xff] %v96_v28  ;;  %v443_v37 = vadd.f32 %v86_v27, %v74_v19  ;;  %237 = vrcp.f32 %v376_v48  ;;  %v95_v58 = vpack.c.bf16 %v421_v21, %v419_v20 }
  0x18   :  { %v107_v38 = vmul.f32 %v435_v32, %v435_v32  ;;  %v108_v39 = vmul.f32 %v437_v33, %v437_v33  ;;  %v109_v42 = vmul.f32 %v439_v34, %v439_v34  ;;  %v97_v59 = vpack.c.bf16 %v437_v33, %v435_v32 }
  0x19   :  { %v112_v40 = vadd.f32 %v111_v36, %v105_v31  ;;  %v98_v41 = vpack.c.bf16 %v443_v37, %v439_v34  ;;  %v110_v45 = vmul.f32 %v443_v37, %v443_v37  ;;  %99 = vst [vmem:[#allocation9] sm:$0xff] %v95_v58  ;;  %v161_v2 = vunpack.c.l.bf16 %v160_v62 }
  0x1a   :  { %v116_v43 = vadd.f32 %v108_v39, %v107_v38  ;;  %101 = vst [vmem:[#allocation9 + $0x10] sm:$0xff] %v97_v59 }
  0x1b   :  { %v113_v44 = vadd.f32 %v112_v40, %v106_v35  ;;  %102 = vst [vmem:[#allocation9 + $0x18] sm:$0xff] %v98_v41  ;;  %v163_v5 = vperm.slane %v161_v2, 0  ;;  %v164_v6 = vperm.slane %v161_v2, 2  ;;  %v165_v7 = vperm.slane %v161_v2, 4 }
  0x1c   :  { %v117_v46 = vadd.f32 %v116_v43, %v109_v42  ;;  %216 = dma.vmem_to_hbm [thread:$0]  %s209_s30, 512, %s211_s7, [#allocation10], %s372_s23, %s372_s23, %s373_s24   ;;  %v166_v8 = vperm.slane %v161_v2, 6 }
  0x1d   :  { %114 = vadd.xlane.f32.xlu0 %v113_v44  ;;  %v238_v49 = vpop.eup %237  ;;  %v171_v13 = vperm.slane %v163_v5, 0  ;;  %v172_v14 = vperm.slane %v164_v6, 0  ;;  %v173_v15 = vperm.slane %v165_v7, 0 }
  0x1e   :  { %v118_v47 = vadd.f32 %v117_v46, %v110_v45  ;;  %v122_v50 = vmul.f32 512.0, %v238_v49  ;;  %vm126_vm0 = vweird.f32 %v238_v49  ;;  %v174_v16 = vperm.slane %v166_v8, 0 }
  0x20   :  { %v123_v51 = vsub.f32 1.0, %v122_v50 }
  0x22   :  { %v124_v52 = vmul.f32 %v238_v49, %v123_v51 }
  0x24   :  { %v125_v53 = vadd.f32 %v238_v49, %v124_v52 }
  0x25   :  { %119 = vadd.xlane.f32.xlu0 %v118_v47 }
  0x26   :  { %v127_v54 = vsel %vm126_vm0, %v238_v49, %v125_v53 }
  0x90   :  { %v115_v55 = vpop.xlane.xlu0 %114 }
  0x91   :  { %v128_v56 = vmul.f32 %v127_v54, %v115_v55 }
  0x93   :  { %v130_v57 = vadd.f32 1e-05, %v128_v56 }
  0x95   :  { %239 = vrsqrt.f32 %v130_v57  ;;  %vm138_vm2 = vweird.f32 %v130_v57 }
  0x98   :  { %v120_v60 = vpop.xlane.xlu0 %119 }
  0x99   :  { %v129_v61 = vmul.f32 %v127_v54, %v120_v60 }
  0x9b   :  { %v240_v63 = vpop.eup %239  ;;  %v131_v0 = vadd.f32 1e-05, %v129_v61 }
  0x9c   :  { %v133_v1 = vmul.f32 %v240_v63, %v130_v57  ;;  %vm139_vm1 = vweird.f32 %v240_v63 }
  0x9d   :  { %241 = vrsqrt.f32 %v131_v0  ;;  %vm140_vm3 = vmor %vm138_vm2, %vm139_vm1  ;;  %vm148_vm5 = vweird.f32 %v131_v0 }
  0x9e   :  { %v134_v3 = vmul.f32 %v240_v63, %v133_v1 }
  0xa0   :  { %v135_v4 = vmul.f32 0.5, %v134_v3 }
  0xa2   :  { %v136_v9 = vsub.f32 1.5, %v135_v4 }
  0xa3   :  { %v242_v10 = vpop.eup %241 }
  0xa4   :  { %v137_v11 = vmul.f32 %v240_v63, %v136_v9  ;;  %v143_v12 = vmul.f32 %v242_v10, %v131_v0  ;;  %vm149_vm4 = vweird.f32 %v242_v10 }
  0xa5   :  { %vm150_vm6 = vmor %vm148_vm5, %vm149_vm4 }
  0xa6   :  { %v141_v17 = vsel %vm140_vm3, %v240_v63, %v137_v11  ;;  %v144_v18 = vmul.f32 %v242_v10, %v143_v12 }
  0xa7   :  { %v152_v19 = vmul.f32 %v141_v17, %v419_v20  ;;  %v153_v24 = vmul.f32 %v141_v17, %v421_v21  ;;  %v154_v25 = vmul.f32 %v141_v17, %v423_v22  ;;  %v155_v26 = vmul.f32 %v141_v17, %v425_v23 }
  0xa8   :  { %v145_v27 = vmul.f32 0.5, %v144_v18 }
  0xa9   :  { %v175_v28 = vmul.f32 %v171_v13, %v152_v19  ;;  %v176_v29 = vmul.f32 %v172_v14, %v153_v24  ;;  %v177_v30 = vmul.f32 %v173_v15, %v154_v25  ;;  %v178_v31 = vmul.f32 %v174_v16, %v155_v26 }
  0xaa   :  { %v146_v35 = vsub.f32 1.5, %v145_v27 }
  0xab   :  { %v183_v36 = vpack.c.bf16 %v176_v29, %v175_v28  ;;  %v184_v38 = vpack.c.bf16 %v178_v31, %v177_v30 }
  0xac   :  { %v147_v39 = vmul.f32 %v242_v10, %v146_v35 }
  0xad   :  { %187 = vst [vmem:[#allocation8] sm:$0xff] %v183_v36 }
  0xae   :  { %v151_v20 = vsel %vm150_vm6, %v242_v10, %v147_v39  ;;  %188 = vst [vmem:[#allocation8 + $0x8] sm:$0xff] %v184_v38 }
  0xaf   :  { %v156_v21 = vmul.f32 %v151_v20, %v435_v32  ;;  %v157_v22 = vmul.f32 %v151_v20, %v437_v33  ;;  %v158_v23 = vmul.f32 %v151_v20, %v439_v34  ;;  %v159_v40 = vmul.f32 %v151_v20, %v443_v37 }
  0xb1   :  { %v179_v41 = vmul.f32 %v171_v13, %v156_v21  ;;  %v180_v42 = vmul.f32 %v172_v14, %v157_v22  ;;  %v181_v43 = vmul.f32 %v173_v15, %v158_v23  ;;  %v182_v44 = vmul.f32 %v174_v16, %v159_v40 }
  0xb3   :  { %v185_v45 = vpack.c.bf16 %v180_v42, %v179_v41  ;;  %v186_v46 = vpack.c.bf16 %v182_v44, %v181_v43 }
  0xb5   :  { %189 = vst [vmem:[#allocation8 + $0x10] sm:$0xff] %v185_v45 }
  0xb6   :  { %190 = vst [vmem:[#allocation8 + $0x18] sm:$0xff] %v186_v46 }
  0xb7   :  { %203 = dma.vmem_to_hbm [thread:$0]  %s196_s8, 512, %s198_s11, [#allocation4], %s372_s23, %s372_s23, %s373_s24  }
  0xb8   :  { %367 = dma.done.wait [#allocation4], 512  }
  0xb9   :  { %368 = vsyncadd [#allocation4], 4294966784 }
  0xba   :  { %369 = dma.done.wait [#allocation10], 512  }
  0xbb   :  { %370 = vsyncadd [#allocation10], 4294966784 }
  0xbc   :  { %225 = vsyncpa [#allocation3], 1 }
  0xbd   :  { %226 = vsyncpa [#allocation6], 1 }
  0xbe   :  { %227 = vsyncpa [#allocation4], 1 }
  0xbf   :  { %228 = vsyncpa [#allocation10], 1 }

</bundles_post_ra>
